<compile_context>
chip_gen: v6e
topology: v6e:2x2x1
jax: 0.10.0
libtpu: 0.0.40
codegen_flags: <defaults>
</compile_context>

<pallas_src>
import jax
import jax.numpy as jnp
from jax.experimental import pallas as pl
from jax.experimental.pallas import tpu as pltpu

_LANE = 128
_SUBLANE = 8
# <= v7x's 64 MiB physical VMEM; raise to 64-96 MiB on v5e/v6e when H is large.
_DEFAULT_VMEM_LIMIT = 48 * 1024 * 1024


# ------------------------------- helpers ------------------------------------

def _round_up(x, m):
    return ((x + m - 1) // m) * m


def _cdiv(a, b):
    return -(-a // b)


def _pad_axis(x, axis, target):
    if x.shape[axis] == target:
        return x
    widths = [(0, 0)] * x.ndim
    widths[axis] = (0, target - x.shape[axis])
    return jnp.pad(x, widths)


def _pick_tiles(B, S, H, n_layers, itemsize, *, b_blk=None, s_blk=None,
                s_blk_target=512, vmem_limit_bytes=_DEFAULT_VMEM_LIMIT):
    """Pick (B_pad, B_blk, S_pad, s_blk) for the masked-mean kernels.

    Streamed per grid step (double-buffered): n_layers activation blocks of
    (B_blk, s_blk, H) plus a (B_blk, 1->8 sublane, s_blk) mask block.  Those are kept
    within ~60% of the scoped-VMEM limit; the rest is headroom for the resident head
    weight, the f32 accumulator scratch and the output buffers.
    """
    budget = int(vmem_limit_bytes * 0.6)
    # bytes per (batch row, seq position) streamed per grid step, x2 double buffers
    per_bs = 2 * itemsize * (n_layers * H + _SUBLANE)

    # ---- batch block: up to 32 rows; B itself when B <= 32 (no batch padding) ----
    if b_blk is not None:
        B_blk = max(1, int(b_blk))
        B_pad = _round_up(B, B_blk)
    elif B <= 32:
        B_blk, B_pad = B, B
    else:
        B_pad = _round_up(B, _SUBLANE)
        B_blk = _SUBLANE
        # Largest block (fewest grid steps) that still leaves room for a 128-wide S
        # block; >= 2 batch blocks also lets v7x shard the 'parallel' axis over 2 TCs.
        for cand in (32, 24, 16, 8):
            if B_pad % cand == 0 and cand * _LANE * per_bs <= budget:
                B_blk = cand
                break

    # ---- sequence block: aim at s_blk_target positions, balanced, multiple of 128 ----
    if s_blk is None:
        S_128 = _round_up(S, _LANE)
        n_steps = _cdiv(S_128, max(s_blk_target, _LANE))
        s_blk = _round_up(_cdiv(S_128, n_steps), _LANE)
        while s_blk > _LANE and B_blk * s_blk * per_bs > budget:
            s_blk -= _LANE
    else:
        s_blk = _round_up(max(int(s_blk), _LANE), _LANE)
    S_pad = _round_up(S, s_blk)
    return B_pad, B_blk, S_pad, s_blk


# ----------------------------- Pallas kernels -------------------------------

def _cls_head_kernel(pooled_ref, w_ref, b_ref, o_ref):
    # pooling_type == 'cls': logits = pooled_output @ W + b   (batch-tiled)
    o_ref[...] = (
        jnp.dot(pooled_ref[...], w_ref[...], preferred_element_type=jnp.float32)
        + b_ref[...]
    )


def _masked_mean_head_kernel_1(seq_ref, mask_ref, inv_ref, w_ref, b_ref, o_ref,
                               acc_ref):
    # pooling_type == 'last_layer':
    #   logits[b] = ((sum_s mask[b,s]*seq[b,s,:]) / clamp(sum_s mask[b,s], 1e-7)) @ W + b
    # grid = (batch blocks, S blocks); masked partial sums accumulate in VMEM scratch.
    si = pl.program_id(1)

    @pl.when(si == 0)
    def _init():
        acc_ref[...] = jnp.zeros_like(acc_ref)

    # Batched masked partial sum on the MXU, f32 accumulation:
    #   (B_blk, 1, s_blk) x (B_blk, s_blk, H) -> (B_blk, 1, H)
    part = jnp.einsum("bqs,bsh->bqh", mask_ref[...], seq_ref[...],
                      preferred_element_type=jnp.float32)
    acc_ref[...] += part[:, 0, :]

    @pl.when(si == pl.num_programs(1) - 1)
    def _finalize():
        pooled = acc_ref[...] * inv_ref[...]     # exact 1/clamp(sum_mask), precomputed
        o_ref[...] = (
            jnp.dot(pooled, w_ref[...], preferred_element_type=jnp.float32)
            + b_ref[...]
        )


def _masked_mean_head_kernel_2(seq1_ref, seq2_ref, mask_ref, inv_ref, w_ref, b_ref,
                               o_ref, acc_ref):
    # pooling_type == 'last_two_layer', folded:
    #   (p1 + p2)/2 = (mask.(seq1) + mask.(seq2)) / (2 * clamp(sum_mask, 1e-7))
    si = pl.program_id(1)

    @pl.when(si == 0)
    def _init():
        acc_ref[...] = jnp.zeros_like(acc_ref)

    m = mask_ref[...]
    # Two separate f32-accumulated MXU dots (MXU has slack in this memory-bound kernel;
    # avoids a full-tile VPU add per step and any bf16 pre-add rounding).
    p1 = jnp.einsum("bqs,bsh->bqh", m, seq1_ref[...],
                    preferred_element_type=jnp.float32)
    p2 = jnp.einsum("bqs,bsh->bqh", m, seq2_ref[...],
                    preferred_element_type=jnp.float32)
    acc_ref[...] += p1[:, 0, :] + p2[:, 0, :]

    @pl.when(si == pl.num_programs(1) - 1)
    def _finalize():
        pooled = acc_ref[...] * inv_ref[...]     # inv already folds the extra /2
        o_ref[...] = (
            jnp.dot(pooled, w_ref[...], preferred_element_type=jnp.float32)
            + b_ref[...]
        )


# --------------------------- pallas_call wrappers ----------------------------

def cls_head(pooled, w, b, *, vmem_limit_bytes=_DEFAULT_VMEM_LIMIT):
    """pooling_type == 'cls': logits = pooled @ W + b, batch-tiled, lane-padded."""
    B, H = pooled.shape
    L = w.shape[-1]
    Lp = _round_up(L, _LANE)
    # feed bf16 straight to the MXU; anything else goes through f32
    op_dtype = (pooled.dtype if pooled.dtype in (jnp.dtype(jnp.bfloat16),
                                                 jnp.dtype(jnp.float32))
                else jnp.dtype(jnp.float32))
    B_blk = min(_round_up(B, _SUBLANE), 256)
    B_pad = _round_up(B, B_blk)

    pooled_p = _pad_axis(pooled.astype(op_dtype), 0, B_pad)
    w_p = _pad_axis(w.astype(op_dtype), 1, Lp)
    b_p = _pad_axis(b.reshape(1, L).astype(jnp.float32), 1, Lp)

    out = pl.pallas_call(
        _cls_head_kernel,
        out_shape=jax.ShapeDtypeStruct((B_pad, Lp), jnp.float32),
        grid=(B_pad // B_blk,),
        in_specs=[
            pl.BlockSpec((B_blk, H), lambda i: (i, 0)),
            pl.BlockSpec((H, Lp), lambda i: (0, 0)),
            pl.BlockSpec((1, Lp), lambda i: (0, 0)),
        ],
        out_specs=pl.BlockSpec((B_blk, Lp), lambda i: (i, 0)),
        compiler_params=pltpu.CompilerParams(
            dimension_semantics=("parallel",),
            vmem_limit_bytes=vmem_limit_bytes),
    )(pooled_p, w_p, b_p)
    return out[:B, :L]


def masked_mean_head(seqs, attention_mask, w, b, *, b_blk=None, s_blk=None,
                     s_blk_target=512, stream_dtype=jnp.float32,
                     vmem_limit_bytes=_DEFAULT_VMEM_LIMIT):
    """Masked-mean pooling over S (1 or 2 encoder layers) fused with the head matmul.

    seqs: tuple of 1 or 2 (B, S, H) arrays.  attention_mask: (B, S) float/bool.
    Grid = (batch blocks 'parallel', S blocks 'arbitrary'); the masked partial sums of a
    whole batch block accumulate in a (B_blk, H) f32 VMEM scratch and the head matmul
    runs only on the last S step.
    """
    n_layers = len(seqs)
    if n_layers not in (1, 2):
        raise ValueError("masked_mean_head expects 1 or 2 sequence layers")
    B, S, H = seqs[0].shape
    L = w.shape[-1]
    Lp = _round_up(L, _LANE)
    stream_dtype = jnp.dtype(stream_dtype)
    B_pad, B_blk, S_pad, s_blk = _pick_tiles(
        B, S, H, n_layers, stream_dtype.itemsize, b_blk=b_blk, s_blk=s_blk,
        s_blk_target=s_blk_target, vmem_limit_bytes=vmem_limit_bytes)

    # stream activations (bf16 halves HBM bytes; fed straight to the MXU, f32 accumulate)
    seqs_p = tuple(
        _pad_axis(_pad_axis(x.astype(stream_dtype), 1, S_pad), 0, B_pad) for x in seqs)
    am = attention_mask.astype(jnp.float32)
    # lane-dense (B_pad, 1, S_pad) mask in the stream dtype (0/1 is exact in bf16);
    # padded positions / rows carry zero mask so the semantics stay exact.
    mask = _pad_axis(_pad_axis(am, 1, S_pad), 0, B_pad)
    mask = mask.reshape(B_pad, 1, S_pad).astype(stream_dtype)
    # exact reciprocal of the clamped mask count, precomputed outside the kernel
    denom = jnp.maximum(am.sum(axis=1, keepdims=True), 1e-7)          # (B, 1)
    if n_layers == 2:
        denom = denom * 2.0                                           # folds (p1+p2)/2
    inv = _pad_axis((1.0 / denom).astype(jnp.float32), 0, B_pad)      # (B_pad, 1)

    w_p = _pad_axis(w.astype(jnp.float32), 1, Lp)
    b_p = _pad_axis(b.reshape(1, L).astype(jnp.float32), 1, Lp)

    seq_spec = pl.BlockSpec((B_blk, s_blk, H), lambda i, s: (i, s, 0))
    in_specs = [seq_spec] * n_layers + [
        pl.BlockSpec((B_blk, 1, s_blk), lambda i, s: (i, 0, s)),   # lane-dense mask chunk
        pl.BlockSpec((B_blk, 1), lambda i, s: (i, 0)),             # 1 / clamp(sum_mask)
        pl.BlockSpec((H, Lp), lambda i, s: (0, 0)),                # head weight (resident)
        pl.BlockSpec((1, Lp), lambda i, s: (0, 0)),                # head bias (resident)
    ]
    kernel = _masked_mean_head_kernel_1 if n_layers == 1 else _masked_mean_head_kernel_2

    out = pl.pallas_call(
        kernel,
        out_shape=jax.ShapeDtypeStruct((B_pad, Lp), jnp.float32),
        grid=(B_pad // B_blk, S_pad // s_blk),
        in_specs=in_specs,
        out_specs=pl.BlockSpec((B_blk, Lp), lambda i, s: (i, 0)),
        scratch_shapes=[pltpu.VMEM((B_blk, H), jnp.float32)],      # masked-sum accumulator
        compiler_params=pltpu.CompilerParams(
            dimension_semantics=("parallel", "arbitrary"),
            vmem_limit_bytes=vmem_limit_bytes),
    )(*seqs_p, mask, inv, w_p, b_p)
    return out[:B, :L]


# ------------------------ ClsHead module (JAX glue) --------------------------

class ClsHeadPallas:
    """Mirrors ClsHead.forward: bert -> pooling -> MLP head (Linear)."""

    def __init__(self, key, vocab_size, hidden_size, num_labels,
                 pooling_type="cls", stream_dtype=jnp.float32, s_blk=None,
                 s_blk_target=512, b_blk=None,
                 vmem_limit_bytes=_DEFAULT_VMEM_LIMIT):
        self.hidden_size = hidden_size
        self.num_labels = num_labels
        self.pooling_type = pooling_type
        self.stream_dtype = stream_dtype
        self.s_blk = s_blk
        self.s_blk_target = s_blk_target
        self.b_blk = b_blk
        self.vmem_limit_bytes = vmem_limit_bytes
        k = jax.random.split(key, 6)
        # synthetic deterministic "BERT" parameters (plain-JAX stand-in)
        self.word_emb = jax.random.normal(k[0], (vocab_size, hidden_size), jnp.float32) * 0.02
        self.type_emb = jax.random.normal(k[1], (2, hidden_size), jnp.float32) * 0.02
        self.layer_w = jax.random.normal(k[2], (hidden_size, hidden_size), jnp.float32) * 0.05
        self.pooler_w = jax.random.normal(k[3], (hidden_size, hidden_size), jnp.float32) * 0.05
        self.pooler_b = jnp.zeros((hidden_size,), jnp.float32)
        # MLP head: Linear(hidden_size -> num_labels)
        self.head_w = jax.random.normal(k[4], (hidden_size, num_labels), jnp.float32) * 0.05
        self.head_b = jax.random.normal(k[5], (1, num_labels), jnp.float32) * 0.01

    def _bert(self, input_ids, token_type_ids, output_all_encoded_layers):
        # TODO(synk): stand-in for BertModel; returns (sequence_outputs, pooled_output).
        emb = self.word_emb[input_ids] + self.type_emb[token_type_ids]        # (B,S,H)
        layer0 = jnp.tanh(emb @ self.layer_w)                                 # (B,S,H)
        layer1 = jnp.tanh(layer0 @ self.layer_w)                              # (B,S,H)
        pooled = jnp.tanh(layer1[:, 0, :] @ self.pooler_w + self.pooler_b)    # (B,H)
        if output_all_encoded_layers:
            return [layer0, layer1], pooled
        return layer1, pooled

    def forward(self, input_ids, attention_mask=None, token_type_ids=None,
                label_ids=None, output_all_encoded_layers=False,
                embedding_for_adv=None):
        del label_ids, embedding_for_adv  # training / adversarial hooks unused here
        B, S = input_ids.shape
        if attention_mask is None:
            attention_mask = jnp.ones((B, S), jnp.float32)
        if token_type_ids is None:
            token_type_ids = jnp.zeros((B, S), jnp.int32)

        sequence_outputs, pooled_output = self._bert(
            input_ids, token_type_ids, output_all_encoded_layers)
        assert pooled_output.ndim == 2 and pooled_output.shape[1] == self.hidden_size

        mm_kwargs = dict(b_blk=self.b_blk, s_blk=self.s_blk,
                         s_blk_target=self.s_blk_target,
                         stream_dtype=self.stream_dtype,
                         vmem_limit_bytes=self.vmem_limit_bytes)
        if self.pooling_type == "cls":
            return cls_head(pooled_output, self.head_w, self.head_b,
                            vmem_limit_bytes=self.vmem_limit_bytes)
        if self.pooling_type == "last_layer":
            seq = sequence_outputs[-1] if output_all_encoded_layers else sequence_outputs
            return masked_mean_head((seq,), attention_mask, self.head_w, self.head_b,
                                    **mm_kwargs)
        if self.pooling_type == "last_two_layer":
            assert output_all_encoded_layers and isinstance(sequence_outputs, list)
            return masked_mean_head(
                (sequence_outputs[-1], sequence_outputs[-2]), attention_mask,
                self.head_w, self.head_b, **mm_kwargs)
        raise Exception("Unknown pooling type %s error" % self.pooling_type)

    # pure-JAX reference for correctness checking
    def forward_ref(self, input_ids, attention_mask=None, token_type_ids=None,
                    output_all_encoded_layers=False):
        B, S = input_ids.shape
        if attention_mask is None:
            attention_mask = jnp.ones((B, S), jnp.float32)
        if token_type_ids is None:
            token_type_ids = jnp.zeros((B, S), jnp.int32)
        sequence_outputs, pooled_output = self._bert(
            input_ids, token_type_ids, output_all_encoded_layers)
        am = attention_mask.astype(jnp.float32)
        if self.pooling_type == "cls":
            before = pooled_output
        elif self.pooling_type == "last_layer":
            seq = sequence_outputs[-1] if output_all_encoded_layers else sequence_outputs
            sm = jnp.maximum(am.sum(1, keepdims=True), 1e-7)
            before = (seq * am[:, :, None]).sum(1) / sm
        elif self.pooling_type == "last_two_layer":
            sm = jnp.maximum(am.sum(1, keepdims=True), 1e-7)
            p1 = (sequence_outputs[-1] * am[:, :, None]).sum(1) / sm
            p2 = (sequence_outputs[-2] * am[:, :, None]).sum(1) / sm
            before = (p1 + p2) / 2.0
        else:
            raise Exception("Unknown pooling type %s error" % self.pooling_type)
        return before @ self.head_w + self.head_b


# ----------------------------------- main ------------------------------------

if __name__ == "__main__":
    key = jax.random.PRNGKey(0)
    k_model, k_ids, k_ids2 = jax.random.split(key, 3)

    B, S, H, V, L = 2, 200, 32, 100, 3
    input_ids = jax.random.randint(k_ids, (B, S), 0, V, dtype=jnp.int32)
    token_type_ids = jnp.zeros((B, S), jnp.int32)
    lens = jnp.array([150, 200], jnp.int32)
    attention_mask = (jnp.arange(S)[None, :] < lens[:, None]).astype(jnp.float32)

    results = []
    # s_blk=128 on the pooling paths forces 2 sequence steps so the VMEM accumulate +
    # finalize pattern is exercised; other runs use the automatic tiling.
    for pooling_type, all_layers, s_blk in [("cls", False, None),
                                            ("last_layer", False, 128),
                                            ("last_two_layer", True, 128)]:
        model = ClsHeadPallas(k_model, V, H, L, pooling_type=pooling_type, s_blk=s_blk)
        out = model.forward(input_ids, attention_mask, token_type_ids,
                            output_all_encoded_layers=all_layers)
        out = jax.block_until_ready(out)
        ref = model.forward_ref(input_ids, attention_mask, token_type_ids,
                                output_all_encoded_layers=all_layers)
        assert out.shape == (B, L)
        assert jnp.allclose(out, ref, rtol=2e-3, atol=2e-3), (
            f"mismatch for pooling_type={pooling_type}")
        results.append(out)

    # bf16 activation streaming (halves HBM bytes; fed directly to the MXU, f32 accum)
    model_bf16 = ClsHeadPallas(k_model, V, H, L, pooling_type="last_layer",
                               stream_dtype=jnp.bfloat16)
    out_bf16 = jax.block_until_ready(
        model_bf16.forward(input_ids, attention_mask, token_type_ids))
    ref_bf16 = model_bf16.forward_ref(input_ids, attention_mask, token_type_ids)
    assert out_bf16.shape == (B, L)
    assert jnp.allclose(out_bf16, ref_bf16, rtol=3e-2, atol=3e-2), "bf16 mismatch"
    results.append(out_bf16)

    # larger batch exercises the B > 32 batch-block tiling path (B_pad=40, B_blk=8)
    B2 = 40
    input_ids2 = jax.random.randint(k_ids2, (B2, S), 0, V, dtype=jnp.int32)
    token_type_ids2 = jnp.zeros((B2, S), jnp.int32)
    lens2 = (jnp.arange(1, B2 + 1) * (S // B2)).astype(jnp.int32)
    attention_mask2 = (jnp.arange(S)[None, :] < lens2[:, None]).astype(jnp.float32)
    model_big = ClsHeadPallas(k_model, V, H, L, pooling_type="last_layer")
    out_big = jax.block_until_ready(
        model_big.forward(input_ids2, attention_mask2, token_type_ids2))
    ref_big = model_big.forward_ref(input_ids2, attention_mask2, token_type_ids2)
    assert out_big.shape == (B2, L)
    assert jnp.allclose(out_big, ref_big, rtol=2e-3, atol=2e-3), "large-batch mismatch"
    results.append(out_big)

    jax.block_until_ready(results)
    print("KERNEL_OK")
</pallas_src>

<mosaic_0001>
module attributes {stable_mosaic.version = 11 : i64} {
  func.func @_cls_head_kernel(%arg0: i32, %arg1: memref<8x32xf32, #tpu.memory_space<vmem>>, %arg2: memref<32x128xf32, #tpu.memory_space<vmem>>, %arg3: memref<1x128xf32, #tpu.memory_space<vmem>>, %arg4: memref<8x128xf32, #tpu.memory_space<vmem>>) attributes {dimension_semantics = [#tpu.dimension_semantics<parallel>], iteration_bounds = array<i64: 1>, scalar_prefetch = 0 : i64, scratch_operands = 0 : i64, tpu.core_type = #tpu.core_type<tc>, window_params = [{transform_indices = @transform_0, window_bounds = array<i64: 8, 32>}, {pipeline_mode = #tpu.pipeline_mode<synchronous>, transform_indices = @transform_1, window_bounds = array<i64: 32, 128>}, {pipeline_mode = #tpu.pipeline_mode<synchronous>, transform_indices = @transform_2, window_bounds = array<i64: 1, 128>}, {transform_indices = @transform_3, window_bounds = array<i64: 8, 128>}]} {
    %c0 = arith.constant 0 : index
    %c0_0 = arith.constant 0 : index
    %0 = vector.load %arg1[%c0, %c0_0] : memref<8x32xf32, #tpu.memory_space<vmem>>, vector<8x32xf32>
    %c0_1 = arith.constant 0 : index
    %c0_2 = arith.constant 0 : index
    %1 = vector.load %arg2[%c0_1, %c0_2] : memref<32x128xf32, #tpu.memory_space<vmem>>, vector<32x128xf32>
    %cst = arith.constant dense<0.000000e+00> : vector<8x128xf32>
    %2 = tpu.matmul %0, %1, %cst {dimension_numbers = #tpu.dot_dimension_numbers<[1], [0], [0], [1], [0, 0, 1, 1], [], []>} : vector<8x32xf32>, vector<32x128xf32>, vector<8x128xf32> -> vector<8x128xf32>
    %c0_3 = arith.constant 0 : index
    %c0_4 = arith.constant 0 : index
    %3 = vector.load %arg3[%c0_3, %c0_4] : memref<1x128xf32, #tpu.memory_space<vmem>>, vector<1x128xf32>
    %4 = vector.broadcast %3 : vector<1x128xf32> to vector<8x128xf32>
    %5 = arith.addf %2, %4 : vector<8x128xf32>
    %c0_5 = arith.constant 0 : index
    %c0_6 = arith.constant 0 : index
    %6 = vector.load %arg4[%c0_5, %c0_6] : memref<8x128xf32, #tpu.memory_space<vmem>>, vector<8x128xf32>
    tpu.vector_store %arg4[%c0_5, %c0_6], %5 {strides = array<i32>} : memref<8x128xf32, #tpu.memory_space<vmem>>, vector<8x128xf32>,
    return
  }
  func.func @transform_0(%arg0: i32) -> (i32, i32) {
    %c0_i32 = arith.constant 0 : i32
    %c0_i32_0 = arith.constant 0 : i32
    return %arg0, %c0_i32 : i32, i32
  }
  func.func @transform_1(%arg0: i32) -> (i32, i32) {
    %c0_i32 = arith.constant 0 : i32
    %c0_i32_0 = arith.constant 0 : i32
    %c0_i32_1 = arith.constant 0 : i32
    return %c0_i32, %c0_i32_0 : i32, i32
  }
  func.func @transform_2(%arg0: i32) -> (i32, i32) {
    %c0_i32 = arith.constant 0 : i32
    %c0_i32_0 = arith.constant 0 : i32
    %c0_i32_1 = arith.constant 0 : i32
    return %c0_i32, %c0_i32_0 : i32, i32
  }
  func.func @transform_3(%arg0: i32) -> (i32, i32) {
    %c0_i32 = arith.constant 0 : i32
    %c0_i32_0 = arith.constant 0 : i32
    return %arg0, %c0_i32 : i32, i32
  }
}

</mosaic_0001>

<bundles_post_ra>
// kernel: tpu_custom_call.1
= control target key start
LH: loop header
LB: loop body
LE: loop exit
PB: predicated region body
PF: predicated region fallthrough
CT: control target
= control target key end

     0   :  { %8 = vsyncpa [#allocation3], 0  ;;  %s274_s0 = inlined_call_operand.hbm [shape: f32[8,32], index: 0, kind: input, shape index: {}]   ;;  %s275_s1 = inlined_call_operand.hbm [shape: f32[32,128], index: 1, kind: input, shape index: {}]   ;;  %s276_s2 = inlined_call_operand.vmem [shape: f32[1,128], index: 2, kind: input, shape index: {}]   ;;  %s277_s3 = inlined_call_operand.hbm [shape: f32[8,128], index: 3, kind: output, shape index: {}]  }
   0x1   :  { %9 = vsyncpa [#allocation6], 0 }
   0x2   :  { %10 = vsyncpa [#allocation4], 0  ;;  %s235_s12 = smov [#allocation2]   ;;  %s236_s14 = smov [#allocation5]  }
   0x3   :  { %s17_s13 = sshll.u32 %s235_s12, 4  ;;  %s26_s15 = sshll.u32 %s236_s14, 4  ;;  %s18_s13 = int_to_ptr.vmem [resolvable:$true] %s17_s13  ;;  %s27_s15 = int_to_ptr.vmem [resolvable:$true] %s26_s15 }
   0x4   :  { %s177_s16 = scalar_lea.vmem %s18_s13, 128  ;;  %p182_p1 = scmp.lt.s32.totalorder %s18_s13, %s18_s13 }
   0x5   :  { %p178_p0 = scmp.ne.s32.totalorder %s18_s13, %s177_s16  ;;  %p183_p2 = scmp.lt.s32.totalorder %s177_s16, %s177_s16 }
   0x7   :  { %p184_p3 = por %p183_p2, %p182_p1 }
   0x9   :  { %p185_p4 = pnand %p184_p3, %p178_p0 }
   0xb   :  { %188 = shalt.err (!%p185_p4)
}
   0xc   :  { %20 = dma.hbm_to_vmem [thread:$0]  %s274_s0, 128, %s18_s13, [#allocation3]  }
   0xd   :  { %s197_s19 = scalar_lea.vmem %s27_s15, 512  ;;  %p202_p6 = scmp.lt.s32.totalorder %s27_s15, %s27_s15 }
   0xe   :  { %p198_p5 = scmp.ne.s32.totalorder %s27_s15, %s197_s19  ;;  %p203_p7 = scmp.lt.s32.totalorder %s197_s19, %s197_s19 }
  0x10   :  { %p204_p8 = por %p203_p7, %p202_p6 }
  0x12   :  { %p205_p9 = pnand %p204_p8, %p198_p5 }
  0x14   :  { %208 = shalt.err (!%p205_p9)
}
  0x15   :  { %s237_s20 = smov 128   ;;  %s238_s21 = smov 8  }
  0x16   :  { %32 = dma.hbm_to_vmem [thread:$0]  %s275_s1, 512, %s27_s15, [#allocation6], %s237_s20, %s237_s20, %s238_s21  }
  0x17   :  { %229 = dma.done.wait [#allocation3], 128  }
  0x18   :  { %230 = vsyncadd [#allocation3], 4294967168 }
  0x19   :  { %231 = dma.done.wait [#allocation6], 512  }
  0x1a   :  { %232 = vsyncadd [#allocation6], 4294966784  ;;  %v239_v0 = vmov 0.0   ;;  %vm240_vm0 = vmmov 0   ;;  %v45_v1 = vld [vmem:[#allocation5 + $0x18] sm:$0xff]  ;;  %v44_v2 = vld [vmem:[#allocation5 + $0x10] sm:$0xff] }
  0x1b   :  { %151 = vmatprep.subr.mxu0 %v239_v0  ;;  %159 = vmatprep.mubr.msk.f32.mxu0 %vm240_vm0, %v239_v0  ;;  %v43_v3 = vld [vmem:[#allocation5 + $0x8] sm:$0xff]  ;;  %v42_v4 = vld [vmem:[#allocation5] sm:$0xff]  ;;  %v41_v5 = vld [vmem:[#allocation2] sm:$0xff]  ;;  %vm53_vm1 = vcmask 261120   ;;  %s241_s24 = smov [#allocation7]  }
  0x1c   :  { %152 = vmatpush3.msra.mxu0 %v45_v1  ;;  %v144_v6 = vld [vmem:[%s276_s2] ss:$0 sm:$0xff]  ;;  %s134_s25 = sshll.u32 %s241_s24, 4  ;;  %s135_s25 = int_to_ptr.vmem [resolvable:$true] %s134_s25 }
  0x1d   :  { %153 = vmatprep.subr.mxu0 %v239_v0  ;;  %s209_s26 = scalar_lea.vmem %s135_s25, 128  ;;  %p214_p11 = scmp.lt.s32.totalorder %s135_s25, %s135_s25 }
  0x1e   :  { %154 = vmatpush3.msra.mxu0 %v44_v2  ;;  %p210_p10 = scmp.ne.s32.totalorder %s135_s25, %s209_s26  ;;  %p215_p12 = scmp.lt.s32.totalorder %s209_s26, %s209_s26 }
  0x1f   :  { %155 = vmatprep.subr.mxu0 %v239_v0 }
  0x20   :  { %156 = vmatpush3.msra.mxu0 %v43_v3  ;;  %p216_p13 = por %p215_p12, %p214_p11 }
  0x21   :  { %157 = vmatprep.subr.mxu0 %v239_v0 }
  0x22   :  { %158 = vmatpush3.msra.mxu0 %v42_v4  ;;  %p217_p0 = pnand %p216_p13, %p210_p10 }
  0x23   :  { %160 = vmatmul.mubr.msk.f32.vlgmr.msra.gmra.mxu0 %vm53_vm1, %v41_v5 }
  0xe3   :  { %v123_v7 = vpop.f32.mrf.mxu0 }
  0xe4   :  { %v124_v8 = vadd.f32 %v144_v6, %v123_v7 }
  0xe5   :  { %v161_v9 = vpop.f32.mrf.mxu0 }
  0xe6   :  { %127 = vst [vmem:[#allocation7] sm:$0xff] %v124_v8 }
  0xe7   :  { %220 = shalt.err (!%p217_p0)
}
  0xe8   :  { %137 = dma.vmem_to_hbm [thread:$0]  %s135_s25, 128, %s277_s3, [#allocation4]  }
  0xe9   :  { %233 = dma.done.wait [#allocation4], 128  }
  0xea   :  { %234 = vsyncadd [#allocation4], 4294967168 }
  0xeb   :  { %141 = vsyncpa [#allocation3], 1 }
  0xec   :  { %142 = vsyncpa [#allocation6], 1 }
  0xed   :  { %143 = vsyncpa [#allocation4], 1 }

</bundles_post_ra>
